<compile_context>
chip_gen: v7x
topology: tpu7x:2x2x1
jax: 0.10.0
libtpu: 0.0.40
codegen_flags: <defaults>
</compile_context>

<pallas_src>
import functools

import jax
import jax.numpy as jnp
from jax.experimental import pallas as pl
from jax.experimental.pallas import tpu as pltpu


def _round_up(x: int, m: int) -> int:
    return (x + m - 1) // m * m


# ----------------------------------------------------------------------------
# One-time hardware / capability probes (cached; never on the per-call path).
# ----------------------------------------------------------------------------
@functools.lru_cache(maxsize=1)
def _vmem_capacity_bytes() -> int:
    """Physical VMEM capacity of the attached TPU (conservative fallback)."""
    if hasattr(pltpu, "get_tpu_info"):
        try:
            cap = getattr(pltpu.get_tpu_info(), "vmem_capacity_bytes", None)
            if cap:
                return int(cap)
        except Exception:  # capability probe only; fall back conservatively
            pass
    return 64 * 1024 * 1024  # assume the smallest (v7x-class) VMEM


@functools.lru_cache(maxsize=1)
def _supports_single_buffered_weight() -> bool:
    """One-time check that pl.Buffered(1) lowers/compiles on this jax+backend."""
    if not hasattr(pl, "Buffered"):
        return False

    def _probe(x_ref, w_ref, o_ref):
        o_ref[...] = x_ref[...] + w_ref[...]

    try:
        fn = pl.pallas_call(
            _probe,
            out_shape=jax.ShapeDtypeStruct((16, 128), jnp.float32),
            grid_spec=pltpu.PrefetchScalarGridSpec(
                num_scalar_prefetch=0,
                grid=(2,),
                in_specs=[
                    pl.BlockSpec((8, 128), lambda i: (i, 0)),
                    pl.BlockSpec((8, 128), lambda i: (0, 0),
                                 pipeline_mode=pl.Buffered(1)),
                ],
                out_specs=pl.BlockSpec((8, 128), lambda i: (i, 0)),
            ),
        )
        jax.jit(fn).lower(
            jax.ShapeDtypeStruct((16, 128), jnp.float32),
            jax.ShapeDtypeStruct((8, 128), jnp.float32),
        ).compile()
        return True
    except Exception:  # capability probe only -> plain double-buffered weight
        return False


# ----------------------------------------------------------------------------
# Tile-size heuristic.
# ----------------------------------------------------------------------------
def _choose_row_tile(rows, H, x_dtype, r_dtype, o_dtype, w_dtype,
                     budget_bytes, weight_buffers, vmem_capacity):
    """Largest MXU-friendly row tile whose streams + f32 scratch fit VMEM."""
    bpe = lambda dt: jnp.dtype(dt).itemsize
    # x / residual / out streams are double-buffered by the pipeline; the f32
    # LayerNorm epilogue keeps ~3-4 live f32 copies of the (tm, H) tile
    # (y, centered diff, normalized/out-before-cast) -> budget 16 B/elem.
    per_row = H * (2 * bpe(x_dtype) + 2 * bpe(r_dtype) + 2 * bpe(o_dtype) + 16)
    fixed = weight_buffers * H * H * bpe(w_dtype) + 6 * H * 4
    avail = max(budget_bytes - fixed, 8 * per_row)

    small_vmem = vmem_capacity <= 64 * 1024 * 1024  # v7x-class chip
    cap = 512 if small_vmem else 1024

    tile = min(cap, avail // per_row, _round_up(rows, 8))

    if small_vmem and rows >= 16:
        # Keep >=2 grid blocks so ("parallel",) can shard across both
        # TensorCores of a v7x chip.
        tile = min(tile, _round_up(-(-rows // 2), 8))

    if tile >= 256:
        tile = (tile // 256) * 256  # fills v6e/v7x 256-wide MXU, 128-aligned for v5e
    else:
        tile = max(8, (tile // 8) * 8)
    return int(tile)


# ----------------------------------------------------------------------------
# Kernel body.
# ----------------------------------------------------------------------------
def _self_output_kernel(x_ref, w_ref, b_ref, res_ref, g_ref, beta_ref, o_ref,
                        *, eps: float, inv_h: float, n_sub: int, sub_rows: int):
    # Dense: y = x @ W_t (+ bias).  W_t is the torch weight transposed ONCE at
    # model-load time, so no per-call transpose and no in-kernel upcast: the
    # MXU runs at the operands' native precision with f32 accumulation.
    w = w_ref[...]
    bias = b_ref[...].astype(jnp.float32)
    gam = g_ref[...].astype(jnp.float32)
    bet = beta_ref[...].astype(jnp.float32)

    # Sub-tiling: on compute-bound configs (e.g. v5e + bf16) this lets the LLO
    # scheduler overlap sub-tile A's VPU/XLU LayerNorm epilogue with the MXU
    # matmul of sub-tile B (vex slot), instead of serializing them.
    for s in range(n_sub):
        rsl = pl.ds(s * sub_rows, sub_rows)  # static offsets

        y = jnp.dot(x_ref[rsl, :], w, preferred_element_type=jnp.float32)
        y = y + bias + res_ref[rsl, :].astype(jnp.float32)

        # StableDropout is identity in eval mode.
        # TODO(synk): training-mode dropout (needs pltpu PRNG mask + rescale).

        # LayerNorm over H (MaskedLayerNorm with mask=None == plain LN).
        # Centered (two-pass) statistics match torch LayerNorm numerics better
        # than E[y^2] - E[y]^2 when |mean| >> std.
        mu = jnp.sum(y, axis=-1, keepdims=True) * inv_h
        d = y - mu
        var = jnp.sum(d * d, axis=-1, keepdims=True) * inv_h
        y_hat = d * jax.lax.rsqrt(var + eps)
        o_ref[rsl, :] = (y_hat * gam + bet).astype(o_ref.dtype)


# ----------------------------------------------------------------------------
# pallas_call builder (cached per configuration -> no per-call rebuild).
# ----------------------------------------------------------------------------
@functools.lru_cache(maxsize=None)
def _build_self_output_call(*, rows, H, row_tile, n_sub, out_dtype, eps,
                            vmem_limit_bytes, single_buffer_weight):
    grid = (pl.cdiv(rows, row_tile),)  # partial last block masked by Pallas
    kernel = functools.partial(_self_output_kernel, eps=eps, inv_h=1.0 / H,
                               n_sub=n_sub, sub_rows=row_tile // n_sub)

    if single_buffer_weight:
        # Constant index_map -> fetched once; a single buffer frees an extra
        # H*H slab of VMEM (matters most on v7x's 64 MiB VMEM).
        w_spec = pl.BlockSpec((H, H), lambda i: (0, 0),
                              pipeline_mode=pl.Buffered(1))
    else:
        w_spec = pl.BlockSpec((H, H), lambda i: (0, 0))

    return pl.pallas_call(
        kernel,
        out_shape=jax.ShapeDtypeStruct((rows, H), jnp.dtype(out_dtype)),
        grid_spec=pltpu.PrefetchScalarGridSpec(
            num_scalar_prefetch=0,
            grid=grid,
            in_specs=[
                pl.BlockSpec((row_tile, H), lambda i: (i, 0)),   # x tile
                w_spec,                                          # W_t (resident)
                pl.BlockSpec((1, H), lambda i: (0, 0)),          # bias
                pl.BlockSpec((row_tile, H), lambda i: (i, 0)),   # residual
                pl.BlockSpec((1, H), lambda i: (0, 0)),          # gamma
                pl.BlockSpec((1, H), lambda i: (0, 0)),          # beta
            ],
            out_specs=pl.BlockSpec((row_tile, H), lambda i: (i, 0)),
        ),
        compiler_params=pltpu.CompilerParams(
            dimension_semantics=("parallel",),
            vmem_limit_bytes=vmem_limit_bytes,
        ),
    )


# ----------------------------------------------------------------------------
# Public wrapper.
# ----------------------------------------------------------------------------
def bert_self_output(hidden_states, input_states, w_t, b, gamma, beta,
                     *, eps=1e-12, row_tile=None):
    """Fused BertSelfOutput forward pass (eval mode).

    hidden_states, input_states: [B, S, H]
    w_t: [H_in, H_out] -- torch nn.Linear weight ([out, in]) transposed ONCE at
         model-load time (not in the per-call path).
    b, gamma, beta: [H]

    Note: the kernel runs at the operands' native dtype (f32 accumulation);
    storing activations/weights in bf16 halves HBM traffic and the resident
    weight footprint where model precision allows.
    """
    B, S, H = hidden_states.shape
    rows = B * S

    # Reshape to lane-dense [rows, H] views (no extra HBM traffic, no padding).
    x2 = hidden_states.reshape(rows, H)
    r2 = input_states.reshape(rows, H)
    b2 = b.reshape(1, H)
    g2 = gamma.reshape(1, H)
    be2 = beta.reshape(1, H)

    # Generation-aware VMEM budget (~80% of capacity, 85% of that for tiles).
    vmem_cap = _vmem_capacity_bytes()
    vmem_limit = min(int(vmem_cap * 0.80), 112 * 1024 * 1024)
    tile_budget = int(vmem_limit * 0.85)

    single_buf = _supports_single_buffered_weight()
    weight_buffers = 1 if single_buf else 2

    if row_tile is None:
        row_tile = _choose_row_tile(rows, H, x2.dtype, r2.dtype,
                                    hidden_states.dtype, w_t.dtype,
                                    tile_budget, weight_buffers, vmem_cap)

    # Split big tiles into 2 sub-tiles inside the body to overlap matmul and
    # LayerNorm epilogue (only helps when compute-bound; never hurts).
    n_sub = 2 if (row_tile >= 512 and row_tile % 16 == 0) else 1

    call = _build_self_output_call(
        rows=rows, H=H, row_tile=int(row_tile), n_sub=n_sub,
        out_dtype=jnp.dtype(hidden_states.dtype).name,
        eps=float(eps), vmem_limit_bytes=int(vmem_limit),
        single_buffer_weight=bool(single_buf))

    out = call(x2, w_t, b2, r2, g2, be2)
    return out.reshape(B, S, H)


def _reference(hidden_states, input_states, w, b, gamma, beta, eps):
    y = jnp.einsum("bsh,oh->bso", hidden_states, w) + b
    y = y + input_states
    mu = jnp.mean(y, axis=-1, keepdims=True)
    var = jnp.mean((y - mu) ** 2, axis=-1, keepdims=True)
    return (y - mu) / jnp.sqrt(var + eps) * gamma + beta


if __name__ == "__main__":
    # NOTE: real BERT sizes (H=768/1024, B*S in the thousands) are where the
    # big-tile / lane-dense layout pays off; this is only a tiny smoke test.
    B, S, H = 2, 8, 32
    eps = 1e-12  # HuggingFace / DeBERTa layer_norm_eps default

    key = jax.random.PRNGKey(0)
    k1, k2, k3, k4 = jax.random.split(key, 4)

    hidden_states = jax.random.normal(k1, (B, S, H), dtype=jnp.float32)
    input_states = jax.random.normal(k2, (B, S, H), dtype=jnp.float32)

    # nn.Linear(H, H): weight [out=H, in=H], bias [H]
    w = jax.random.normal(k3, (H, H), dtype=jnp.float32) * 0.05
    b = jax.random.normal(k4, (H,), dtype=jnp.float32) * 0.05
    # LayerNorm params
    gamma = jnp.ones((H,), dtype=jnp.float32)
    beta = jnp.zeros((H,), dtype=jnp.float32)

    # One-time, load-time layout conversion (torch [out, in] -> [in, out]);
    # NOT part of the per-call path.
    w_t = jnp.asarray(w.T)

    out = bert_self_output(hidden_states, input_states, w_t, b, gamma, beta,
                           eps=eps)
    out = jax.block_until_ready(out)

    ref = _reference(hidden_states, input_states, w, b, gamma, beta, eps)
    assert out.shape == (B, S, H)
    assert jnp.allclose(out, ref, atol=1e-4, rtol=1e-4)

    print("KERNEL_OK")
</pallas_src>

<mosaic_0001>
module attributes {stable_mosaic.version = 11 : i64} {
  func.func @_self_output_kernel(%arg0: i32, %arg1: memref<8x32xf32, #tpu.memory_space<vmem>>, %arg2: memref<32x32xf32, #tpu.memory_space<vmem>>, %arg3: memref<1x32xf32, #tpu.memory_space<vmem>>, %arg4: memref<8x32xf32, #tpu.memory_space<vmem>>, %arg5: memref<1x32xf32, #tpu.memory_space<vmem>>, %arg6: memref<1x32xf32, #tpu.memory_space<vmem>>, %arg7: memref<8x32xf32, #tpu.memory_space<vmem>>) attributes {dimension_semantics = [#tpu.dimension_semantics<parallel>], iteration_bounds = array<i64: 2>, scalar_prefetch = 0 : i64, scratch_operands = 0 : i64, tpu.core_type = #tpu.core_type<tc>, window_params = [{transform_indices = @transform_0, window_bounds = array<i64: 8, 32>}, {pipeline_mode = #tpu.pipeline_mode<synchronous>, transform_indices = @transform_1, window_bounds = array<i64: 32, 32>}, {pipeline_mode = #tpu.pipeline_mode<synchronous>, transform_indices = @transform_2, window_bounds = array<i64: 1, 32>}, {transform_indices = @transform_3, window_bounds = array<i64: 8, 32>}, {pipeline_mode = #tpu.pipeline_mode<synchronous>, transform_indices = @transform_4, window_bounds = array<i64: 1, 32>}, {pipeline_mode = #tpu.pipeline_mode<synchronous>, transform_indices = @transform_5, window_bounds = array<i64: 1, 32>}, {transform_indices = @transform_6, window_bounds = array<i64: 8, 32>}]} {
    %c0 = arith.constant 0 : index
    %c0_0 = arith.constant 0 : index
    %0 = vector.load %arg2[%c0, %c0_0] : memref<32x32xf32, #tpu.memory_space<vmem>>, vector<32x32xf32>
    %c0_1 = arith.constant 0 : index
    %c0_2 = arith.constant 0 : index
    %1 = vector.load %arg3[%c0_1, %c0_2] : memref<1x32xf32, #tpu.memory_space<vmem>>, vector<1x32xf32>
    %c0_3 = arith.constant 0 : index
    %c0_4 = arith.constant 0 : index
    %2 = vector.load %arg5[%c0_3, %c0_4] : memref<1x32xf32, #tpu.memory_space<vmem>>, vector<1x32xf32>
    %c0_5 = arith.constant 0 : index
    %c0_6 = arith.constant 0 : index
    %3 = vector.load %arg6[%c0_5, %c0_6] : memref<1x32xf32, #tpu.memory_space<vmem>>, vector<1x32xf32>
    %c0_7 = arith.constant 0 : index
    %c0_8 = arith.constant 0 : index
    %4 = vector.load %arg1[%c0_7, %c0_8] : memref<8x32xf32, #tpu.memory_space<vmem>>, vector<8x32xf32>
    %cst = arith.constant dense<0.000000e+00> : vector<8x32xf32>
    %5 = tpu.matmul %4, %0, %cst {dimension_numbers = #tpu.dot_dimension_numbers<[1], [0], [0], [1], [0, 0, 1, 1], [], []>} : vector<8x32xf32>, vector<32x32xf32>, vector<8x32xf32> -> vector<8x32xf32>
    %6 = vector.broadcast %1 : vector<1x32xf32> to vector<8x32xf32>
    %7 = arith.addf %5, %6 : vector<8x32xf32>
    %c0_9 = arith.constant 0 : index
    %c0_10 = arith.constant 0 : index
    %8 = vector.load %arg4[%c0_9, %c0_10] : memref<8x32xf32, #tpu.memory_space<vmem>>, vector<8x32xf32>
    %9 = arith.addf %7, %8 : vector<8x32xf32>
    %cst_11 = arith.constant dense<0.000000e+00> : vector<8xf32>
    %10 = vector.multi_reduction <add>, %9, %cst_11 [1] : vector<8x32xf32> to vector<8xf32>
    %11 = vector.shape_cast %10 : vector<8xf32> to vector<8x1xf32>
    %cst_12 = arith.constant 3.125000e-02 : f32
    %12 = vector.broadcast %cst_12 : f32 to vector<8x1xf32>
    %13 = arith.mulf %11, %12 : vector<8x1xf32>
    %14 = vector.broadcast %13 : vector<8x1xf32> to vector<8x32xf32>
    %15 = arith.subf %9, %14 : vector<8x32xf32>
    %16 = arith.mulf %15, %15 : vector<8x32xf32>
    %cst_13 = arith.constant dense<0.000000e+00> : vector<8xf32>
    %17 = vector.multi_reduction <add>, %16, %cst_13 [1] : vector<8x32xf32> to vector<8xf32>
    %18 = vector.shape_cast %17 : vector<8xf32> to vector<8x1xf32>
    %cst_14 = arith.constant 3.125000e-02 : f32
    %19 = vector.broadcast %cst_14 : f32 to vector<8x1xf32>
    %20 = arith.mulf %18, %19 : vector<8x1xf32>
    %cst_15 = arith.constant 9.99999996E-13 : f32
    %21 = vector.broadcast %cst_15 : f32 to vector<8x1xf32>
    %22 = arith.addf %20, %21 : vector<8x1xf32>
    %23 = math.rsqrt %22 : vector<8x1xf32>
    %24 = vector.broadcast %23 : vector<8x1xf32> to vector<8x32xf32>
    %25 = arith.mulf %15, %24 : vector<8x32xf32>
    %26 = vector.broadcast %2 : vector<1x32xf32> to vector<8x32xf32>
    %27 = arith.mulf %25, %26 : vector<8x32xf32>
    %28 = vector.broadcast %3 : vector<1x32xf32> to vector<8x32xf32>
    %29 = arith.addf %27, %28 : vector<8x32xf32>
    %c0_16 = arith.constant 0 : index
    %c0_17 = arith.constant 0 : index
    %30 = vector.load %arg7[%c0_16, %c0_17] : memref<8x32xf32, #tpu.memory_space<vmem>>, vector<8x32xf32>
    tpu.vector_store %arg7[%c0_16, %c0_17], %29 {strides = array<i32>} : memref<8x32xf32, #tpu.memory_space<vmem>>, vector<8x32xf32>,
    return
  }
  func.func @transform_0(%arg0: i32) -> (i32, i32) {
    %c0_i32 = arith.constant 0 : i32
    %c0_i32_0 = arith.constant 0 : i32
    return %arg0, %c0_i32 : i32, i32
  }
  func.func @transform_1(%arg0: i32) -> (i32, i32) {
    %c0_i32 = arith.constant 0 : i32
    %c0_i32_0 = arith.constant 0 : i32
    %c0_i32_1 = arith.constant 0 : i32
    return %c0_i32, %c0_i32_0 : i32, i32
  }
  func.func @transform_2(%arg0: i32) -> (i32, i32) {
    %c0_i32 = arith.constant 0 : i32
    %c0_i32_0 = arith.constant 0 : i32
    %c0_i32_1 = arith.constant 0 : i32
    return %c0_i32, %c0_i32_0 : i32, i32
  }
  func.func @transform_3(%arg0: i32) -> (i32, i32) {
    %c0_i32 = arith.constant 0 : i32
    %c0_i32_0 = arith.constant 0 : i32
    return %arg0, %c0_i32 : i32, i32
  }
  func.func @transform_4(%arg0: i32) -> (i32, i32) {
    %c0_i32 = arith.constant 0 : i32
    %c0_i32_0 = arith.constant 0 : i32
    %c0_i32_1 = arith.constant 0 : i32
    return %c0_i32, %c0_i32_0 : i32, i32
  }
  func.func @transform_5(%arg0: i32) -> (i32, i32) {
    %c0_i32 = arith.constant 0 : i32
    %c0_i32_0 = arith.constant 0 : i32
    %c0_i32_1 = arith.constant 0 : i32
    return %c0_i32, %c0_i32_0 : i32, i32
  }
  func.func @transform_6(%arg0: i32) -> (i32, i32) {
    %c0_i32 = arith.constant 0 : i32
    %c0_i32_0 = arith.constant 0 : i32
    return %arg0, %c0_i32 : i32, i32
  }
}

</mosaic_0001>

<bundles_post_ra>
// kernel: tpu_custom_call.1
= control target key start
LH: loop header
LB: loop body
LE: loop exit
PB: predicated region body
PF: predicated region fallthrough
CT: control target
= control target key end

     0   :  { %s1127_s0 = inlined_call_operand.hbm [shape: f32[16,32], index: 0, kind: input, shape index: {}]   ;;  %s1128_s1 = inlined_call_operand.hbm [shape: f32[32,32], index: 1, kind: input, shape index: {}]   ;;  %s1129_s2 = inlined_call_operand.vmem [shape: f32[1,32], index: 2, kind: input, shape index: {}]   ;;  %s1130_s3 = inlined_call_operand.hbm [shape: f32[16,32], index: 3, kind: input, shape index: {}]   ;;  %s1131_s4 = inlined_call_operand.vmem [shape: f32[1,32], index: 4, kind: input, shape index: {}]   ;;  %s1132_s5 = inlined_call_operand.vmem [shape: f32[1,32], index: 5, kind: input, shape index: {}]   ;;  %s1133_s6 = inlined_call_operand.hbm [shape: f32[16,32], index: 6, kind: output, shape index: {}]  }
   0x1   :  { %1139 = sst [smem:[#allocation13_spill]] %s1127_s0 }
   0x2   :  { %1140 = sst [smem:[#allocation14_spill]] %s1130_s3 }
   0x3   :  { %11 = vsyncpa [#allocation3], 0 }
   0x4   :  { %13 = vsyncpa [#allocation3 + $0x1], 0 }
   0x5   :  { %14 = vsyncpa [#allocation6], 0 }
   0x6   :  { %15 = vsyncpa [#allocation4], 0 }
   0x7   :  { %17 = vsyncpa [#allocation4 + $0x1], 0  ;;  %s868_s21 = smov 0   ;;  %s870_s22 = smov 0  }
   0x8   :  { %s872_s23 = smov 0   ;;  %s874_s24 = smov 0  }
   0x9 LB: > { %s889_s25 = sadd.s32 1, %s822_s24   ;;  %s30_s26 = sadd.s32 1, %s818_s23  ;;  %s822_s24 = sphi %s874_s24, %s1160_s24   ;;  %s818_s23 = sphi %s872_s23, %s1159_s23   ;;  %s814_s22 = sphi %s870_s22, %s1158_s22   ;;  %s810_s21 = sphi %s868_s21, %s1157_s21  }
   0xa   : > { %s27_s27 = ssub.s32 %s822_s24, %s889_s25  ;;  %p37_p0 = scmp.ne.s32.totalorder %s818_s23, %s814_s22 }
   0xb   : > { %p28_p1 = scmp.eq.s32.totalorder %s27_s27, 0  ;;  %p38_p2 = scmp.eq.s32.totalorder %s822_s24, 0 }
   0xc   : > { %p617_p4 = scmp.lt.s32.totalorder %s822_s24, 2  ;;  %s225_s29 = sand.u32 1, %s822_s24  }
   0xd   : > { %s900_s28 = scalar_select %p28_p1, %s818_s23, %s30_s26  }
   0xe   : > { %p39_p5 = por %p38_p2, %p37_p0  ;;  %s227_s30 = sand.u32 1, %s818_s23  }
   0xf   : > { %s907_s7 = sshll.u32 %s227_s30, 3  ;;  %s553_s8 = sshll.u32 %s822_s24, 7 }
  0x10   : > { %s1141_s0 = sld [smem:[#allocation13_spill]]  ;;  %s229_s12 = scalar_lea.vmem [#allocation2], %s907_s7 }
  0x11   : > { %s236_s13 = sshll.u32 %s229_s12, 4  ;;  %p918_p6 = pnand %p617_p4, %p39_p5  ;;  %s922_s13 = int_to_ptr.vmem [resolvable:$true] %s236_s13 }
  0x12   : > { %s924_s15 = scalar_lea.sflag [#allocation3], %s225_s29 }
  0x13   : > { %p662_p8 = pneg %p918_p6 }
  0x16   : > { %s915_s11 = scalar_lea.hbm %s1141_s0, %s553_s8  ;;  %s665_s19 = scalar_lea.hbm %s1141_s0, 256 }
  0x17   : > { %s660_s16 = scalar_lea.hbm %s915_s11, 128  ;;  %p666_p11 = scmp.lt.u32.totalorder %s915_s11, %s1141_s0 }
  0x18   : > { %p661_p7 = scmp.ne.s32.totalorder %s915_s11, %s660_s16  ;;  %p667_p12 = scmp.lt.u32.totalorder %s665_s19, %s660_s16 }
  0x19   : > { %p669_p1 = scmp.lt.u32.totalorder %s660_s16, %s915_s11 }
  0x1a   : > { %p663_p9 = pnand %p662_p8, %p661_p7  ;;  %p668_p13 = por %p667_p12, %p666_p11 }
  0x1c   : > { %p664_p10 = pneg %p663_p9  ;;  %p670_p2 = por %p669_p1, %p668_p13 }
  0x1e   : > { %p671_p4 = pnand %p670_p2, %p664_p10 }
  0x20   : > { %674 = shalt.err (!%p671_p4)
}
  0x21   : > { %s675_s27 = scalar_lea.vmem %s922_s13, 128  ;;  %s824_s29 = smov [#allocation2]  }
  0x22   : > { %p676_p5 = scmp.ne.s32.totalorder %s922_s13, %s675_s27  ;;  %s680_s30 = sshll.u32 %s824_s29, 4  ;;  %s681_s30 = int_to_ptr.vmem [resolvable:$false] %s680_s30 }
  0x23   : > { %s682_s9 = scalar_lea.vmem %s681_s30, 256  ;;  %p683_p3 = scmp.lt.s32.totalorder %s922_s13, %s681_s30 }
  0x24   : > { %p678_p7 = pnand %p676_p5, %p662_p8  ;;  %p684_p11 = scmp.lt.s32.totalorder %s682_s9, %s675_s27 }
  0x26   : > { %p679_p9 = pneg %p678_p7  ;;  %p685_p12 = por %p684_p11, %p683_p3 }
  0x28   : > { %p686_p13 = pnand %p685_p12, %p679_p9 }
  0x2a   : > { %689 = shalt.err (!%p686_p13)
}
  0x2b   : > { %608 = dma.hbm_to_vmem [thread:$0]  (!%p918_p6), %s915_s11, 128, %s922_s13, %s924_s15  }
  0x2c   : > { %s953_s10 = sadd.s32 4294967295, %s822_s24   ;;  %s548_s12 = sadd.s32 4294967294, %s822_s24  }
  0x2d   : > { %p43_p3 = scmp.ne.s32.totalorder %s814_s22, %s810_s21  ;;  %p1134_p10 = scmp.eq.s32.totalorder %s953_s10, 0 }
  0x2e   : > { %p177_p1 = scmp.eq.s32.totalorder %s953_s10, 1  ;;  %p183_p2 = scmp.eq.s32.totalorder %s548_s12, 1 }
  0x2f   : > { %p962_p4 = por %p1134_p10, %p43_p3  ;;  %p549_p5 = scmp.ge.s32.totalorder %s822_s24, 1 }
  0x30   : > { %p970_p7 = por %p177_p1, %p37_p0  ;;  %p974_p9 = por %p183_p2, %p43_p3 }
  0x31   : > { %s1143_s16 = scalar_select %p962_p4, 1, 0 }
  0x32   : > { %s1144_s11 = scalar_select %p970_p7, 1, 0 }
  0x33   : > { %s1145_s13 = scalar_select %p974_p9, 1, 0 }
  0x34   : > { %p190_p11 = scmp.lt.s32.totalorder %s822_s24, 3  ;;  %s825_s18 = smov [#allocation5]  }
  0x35   : > { %s202_s19 = sshll.u32 %s825_s18, 4  ;;  %s1147_s3 = sld [smem:[#allocation14_spill]]  ;;  %s993_s19 = int_to_ptr.vmem [resolvable:$true] %s202_s19 }
  0x36   : > { %p979_p12 = pnand %p549_p5, %p190_p11  ;;  %s247_s29 = scalar_lea.vmem [#allocation7], %s907_s7 }
  0x37   : > { %s254_s30 = sshll.u32 %s247_s29, 4  ;;  %s255_s30 = int_to_ptr.vmem [resolvable:$true] %s254_s30 }
  0x38   : > { %s1146_s17 = scalar_select %p979_p12, 1, 0 }
  0x39   : > { %p601_p0 = pneg %p979_p12 }
  0x3b   : > { %s988_s27 = scalar_lea.hbm %s1147_s3, %s553_s8  ;;  %p997_p13 = pnand %p601_p0, %p1134_p10 }
  0x3c   : > { %s690_s12 = scalar_lea.hbm %s988_s27, 128  ;;  %s695_s20 = scalar_lea.hbm %s1147_s3, 256 }
  0x3d   : > { %s1148_s9 = scalar_select %p997_p13, 1, 0 }
  0x3e   : > { %p691_p3 = scmp.ne.s32.totalorder %s988_s27, %s690_s12  ;;  %p696_p5 = scmp.lt.u32.totalorder %s988_s27, %s1147_s3 }
  0x3f   : > { %p697_p11 = scmp.lt.u32.totalorder %s695_s20, %s690_s12  ;;  %p699_p0 = scmp.lt.u32.totalorder %s690_s12, %s988_s27 }
  0x40   : > { %p693_p1 = pnand %p691_p3, %p662_p8 }
  0x41   : > { %p698_p9 = por %p697_p11, %p696_p5 }
  0x42   : > { %p694_p2 = pneg %p693_p1 }
  0x43   : > { %p700_p10 = por %p699_p0, %p698_p9 }
  0x45   : > { %p701_p7 = pnand %p700_p10, %p694_p2 }
  0x47   : > { %704 = shalt.err (!%p701_p7)
}
  0x48   : > { %s705_s29 = scalar_lea.vmem %s255_s30, 128  ;;  %s826_s0 = smov [#allocation7]  }
  0x49   : > { %p706_p4 = scmp.ne.s32.totalorder %s255_s30, %s705_s29  ;;  %s710_s8 = sshll.u32 %s826_s0, 4  ;;  %s711_s8 = int_to_ptr.vmem [resolvable:$false] %s710_s8 }
  0x4a   : > { %s712_s18 = scalar_lea.vmem %s711_s8, 256  ;;  %p713_p12 = scmp.lt.s32.totalorder %s255_s30, %s711_s8 }
  0x4b   : > { %p708_p3 = pnand %p706_p4, %p662_p8  ;;  %p714_p13 = scmp.lt.s32.totalorder %s712_s18, %s705_s29 }
  0x4d   : > { %p709_p1 = pneg %p708_p3  ;;  %p715_p5 = por %p714_p13, %p713_p12 }
  0x4f   : > { %p716_p11 = pnand %p715_p5, %p709_p1 }
  0x51   : > { %719 = shalt.err (!%p716_p11)
}
  0x52   : > { %611 = dma.hbm_to_vmem [thread:$0]  (!%p918_p6), %s988_s27, 128, %s255_s30, %s924_s15  }
  0x53   : > { %s720_s7 = scalar_lea.hbm %s1128_s1, 512  ;;  %p1149_p10 = scmp.ne.s32.totalorder %s1148_s9, 0 }
  0x54   : > { %p721_p8 = scmp.ne.s32.totalorder %s1128_s1, %s720_s7  ;;  %p727_p12 = scmp.lt.u32.totalorder %s720_s7, %s1128_s1 }
  0x55   : > { %p722_p4 = pneg %p1149_p10 }
  0x57   : > { %p723_p7 = pnand %p722_p4, %p721_p8 }
  0x59   : > { %p724_p9 = pneg %p723_p7 }
  0x5b   : > { %p729_p13 = pnand %p727_p12, %p724_p9 }
  0x5d   : > { %732 = shalt.err (!%p729_p13)
}
  0x5e   : > { %s733_s14 = scalar_lea.vmem %s993_s19, 512  ;;  %p741_p3 = scmp.lt.s32.totalorder %s993_s19, %s993_s19 }
  0x5f   : > { %p734_p6 = scmp.ne.s32.totalorder %s993_s19, %s733_s14  ;;  %p742_p1 = scmp.lt.s32.totalorder %s733_s14, %s733_s14 }
  0x61   : > { %p736_p2 = pnand %p734_p6, %p722_p4  ;;  %p743_p5 = por %p742_p1, %p741_p3 }
  0x63   : > { %p737_p0 = pneg %p736_p2 }
  0x65   : > { %p744_p11 = pnand %p743_p5, %p737_p0 }
  0x67   : > { %747 = shalt.err (!%p744_p11)
}
  0x68   : > { %s827_s3 = smov 128   ;;  %s828_s15 = smov 8  }
  0x69   : > { %604 = dma.hbm_to_vmem [thread:$0]  (!%p1149_p10), %s1128_s1, 512, %s993_s19, [#allocation6], %s827_s3, %s827_s3, %s828_s15  }
  0x6a   : > { %p1150_p8 = scmp.ne.s32.totalorder %s1146_s17, 0 }
  0x6b   : > { %s265_s8 = sand.u32 (!%p1150_p8), 1, %s953_s10   ;;  %s267_s18 = sand.u32 (!%p1150_p8), 1, %s814_s22  }
  0x6c   : > { %263 = sbr.rel (%p1150_p8) target bundleno = 675 (0x2a3), region = 44  ;;  %s1048_s12 = sshll.u32 (!%p1150_p8), %s267_s18, 3 }
  0x6d   : > { %s266_s20 = scalar_lea.sflag (!%p1150_p8), [#allocation3], %s265_s8  ;;  %s269_s7 = scalar_lea.vmem (!%p1150_p8), [#allocation2], %s1048_s12 }
  0x6e   : > { %p1151_p4 = scmp.ne.s32.totalorder (!%p1150_p8), %s1143_s16, 0 }
  0x73   : > { %793 = dma.done.wait (%p1151_p4), %s266_s20, 128  }
  0x74   : > { %795 = vsyncadd (%p1151_p4), %s266_s20, 4294967168  ;;  %p1152_p10 = scmp.eq.s32.totalorder %s953_s10, 0 }
  0x76   : > { %797 = dma.done.wait (%p1152_p10), [#allocation6], 512   ;;  %p1153_p7 = pmov %p1152_p10 }
  0x77   : > { %s282_s17 = scalar_lea.vmem [#allocation7], %s1048_s12 }
  0x78   : > { %799 = vsyncadd (%p1153_p7), [#allocation6], 4294966784 }
  0x79   : > { %801 = dma.done.wait (%p1151_p4), %s266_s20, 128  }
  0x7a   : > { %803 = vsyncadd (%p1151_p4), %s266_s20, 4294967168  ;;  %v829_v0 = vmov 0.0|0.0   ;;  %vm830_vm0 = vmmov 0   ;;  %v831_v1 = vmov 0.0   ;;  %v316_v2 = vld [vmem:[#allocation5] sm:$0xff]  ;;  %v317_v3 = vld [vmem:[#allocation5 + $0x8] sm:$0xff] }
  0x7b   : > { %585 = vmatprep.subr.bf16.mxu0 %v829_v0  ;;  %582 = vmatprep.mubr.msk.f32.mxu0 %vm830_vm0, %v831_v1  ;;  %v318_v4 = vld [vmem:[#allocation5 + $0x10] sm:$0xff]  ;;  %v586_v5 = vpack.c.bf16 %v317_v3, %v316_v2  ;;  %v319_v6 = vld [vmem:[#allocation5 + $0x18] sm:$0xff]  ;;  %vm330_vm1 = vcmask 261120   ;;  %v404_v11 = vld [vmem:[%s282_s17] sm:$0xff]  ;;  %s566_s14 = sshll.u32 %s953_s10, 7  ;;  %s315_s3 = scalar_lea.vmem [#allocation8], %s1048_s12 }
  0x7c   : > { %v589_v7 = vpack.c.bf16 %v319_v6, %v318_v4  ;;  %v323_v8 = vld [vmem:[%s269_s7] sm:$0xff]  ;;  %s448_s15 = sshll.u32 %s315_s3, 4  ;;  %s1081_s8 = scalar_lea.hbm %s1133_s6, %s566_s14  ;;  %s1083_s15 = int_to_ptr.vmem [resolvable:$true] %s448_s15 }
  0x7d   : > { %587 = vmatpush3.bf16.msra.mxu0 %v586_v5  ;;  %v561_v9 = vld [vmem:[%s1129_s2] ss:$0 sm:$0xff]  ;;  %s435_s20 = scalar_lea.sflag [#allocation4], %s267_s18  ;;  %s748_s7 = scalar_lea.vmem %s1083_s15, 128 }
  0x7e   : > { %588 = vmatprep.subr.bf16.mxu0 %v829_v0  ;;  %v563_v25 = vld [vmem:[%s1131_s4] ss:$0 sm:$0xff]  ;;  %p749_p9 = scmp.ne.s32.totalorder %s1083_s15, %s748_s7  ;;  %p1154_p12 = scmp.ne.s32.totalorder %s1144_s11, 0 }
  0x7f   : > { %v564_v27 = vld [vmem:[%s1132_s5] ss:$0 sm:$0xff]  ;;  %s832_s10 = smov [#allocation8]  }
  0x80   : > { %p750_p13 = pnand %p749_p9, %p1154_p12  ;;  %s752_s12 = sshll.u32 %s832_s10, 4  ;;  %s753_s12 = int_to_ptr.vmem [resolvable:$false] %s752_s12 }
  0x81   : > { %590 = vmatpush3.bf16.msra.mxu0 %v589_v7  ;;  %s754_s17 = scalar_lea.vmem %s753_s12, 256  ;;  %p755_p2 = scmp.lt.s32.totalorder %s1083_s15, %s753_s12 }
  0x82   : > { %p751_p6 = pneg %p750_p13  ;;  %p756_p0 = scmp.lt.s32.totalorder %s754_s17, %s748_s7 }
  0x84   : > { %583 = vmatmul.mubr.msk.f32.vlgmr.msra.gmra.mrb[0].mxu0 %vm330_vm1, %v323_v8  ;;  %p757_p3 = por %p756_p0, %p755_p2 }
  0x86   : > { %p758_p1 = pnand %p757_p3, %p751_p6 }
 0x157   : > { %v400_v10 = vpop.f32.mrb[0].mxu0 }
 0x158   : > { %v401_v12 = vadd.f32 %v561_v9, %v400_v10  ;;  %v584_v13 = vpop.f32.mrb[1].mxu0 }
 0x15a   : > { %v405_v14 = vadd.f32 %v404_v11, %v401_v12 }
 0x15c   : > { %v406_v15 = vsel %vm330_vm1, %v405_v14, 0.0 }
 0x15d   : > { %407 = vadd.xlane.f32.xlu0 %v406_v15 }
 0x1ea   : > { %v408_v16 = vpop.xlane.xlu0 %407 }
 0x1eb   : > { %v409_v17 = vmul.f32 0.03125, %v408_v16 }
 0x1ed   : > { %v410_v18 = vsub.f32 %v405_v14, %v409_v17 }
 0x1ef   : > { %v411_v19 = vmul.f32 %v410_v18, %v410_v18 }
 0x1f1   : > { %v412_v20 = vsel %vm330_vm1, %v411_v19, 0.0 }
 0x1f2   : > { %413 = vadd.xlane.f32.xlu0 %v412_v20 }
 0x27f   : > { %v414_v21 = vpop.xlane.xlu0 %413 }
 0x280   : > { %v415_v22 = vmul.f32 0.03125, %v414_v21 }
 0x282   : > { %v416_v23 = vadd.f32 1e-12, %v415_v22 }
 0x284   : > { %658 = vrsqrt.f32 %v416_v23 }
 0x28e   : > { %v659_v24 = vpop.eup %658 }
 0x28f   : > { %v418_v26 = vmul.f32 %v659_v24, %v410_v18 }
 0x291   : > { %v425_v28 = vmul.f32 %v563_v25, %v418_v26 }
 0x293   : > { %v432_v29 = vadd.f32 %v564_v27, %v425_v28 }
 0x295   : > { %433 = vst.msk [vmem:[%s315_s3] sm:$0xff] %vm330_vm1, %v432_v29 }
 0x296   : > { %761 = shalt.err (!%p758_p1)
}
 0x297   : > { %s762_s18 = scalar_lea.hbm %s1081_s8, 128  ;;  %s766_s9 = scalar_lea.hbm %s1133_s6, 256 }
 0x298   : > { %p763_p5 = scmp.ne.s32.totalorder %s1081_s8, %s762_s18  ;;  %p767_p4 = scmp.lt.u32.totalorder %s1081_s8, %s1133_s6 }
 0x299   : > { %p768_p10 = scmp.lt.u32.totalorder %s766_s9, %s762_s18  ;;  %p770_p9 = scmp.lt.u32.totalorder %s762_s18, %s1081_s8 }
 0x29a   : > { %p764_p11 = pnand %p763_p5, %p1154_p12 }
 0x29b   : > { %p769_p7 = por %p768_p10, %p767_p4 }
 0x29c   : > { %p765_p8 = pneg %p764_p11 }
 0x29d   : > { %p771_p13 = por %p770_p9, %p769_p7 }
 0x29f   : > { %p772_p6 = pnand %p771_p13, %p765_p8 }
 0x2a1   : > { %775 = shalt.err (!%p772_p6)
}
 0x2a2   : > { %599 = dma.vmem_to_hbm [thread:$0]  (%p1154_p12), %s1083_s15, 128, %s1081_s8, %s435_s20  }
 0x2a3 PF: > { %s460_s29 = sand.u32 1, %s810_s21   ;;  %p1155_p2 = scmp.ne.s32.totalorder %s1145_s13, 0 }
 0x2a4   : > { %p1156_p0 = scmp.ge.s32.totalorder %s822_s24, 2  ;;  %s461_s14 = scalar_lea.sflag [#allocation4], %s460_s29 }
 0x2a6   : > { %p613_p3 = pnand %p1156_p0, %p1155_p2 }
 0x2a8   : > { %805 = dma.done.wait (!%p613_p3), %s461_s14, 128  }
 0x2a9   : > { %807 = vsyncadd (!%p613_p3), %s461_s14, 4294967168  ;;  %p20_p1 = scmp.ge.s32.totalorder %s889_s25, 4   ;;  %s1157_s21 = smov %s814_s22 }
 0x2aa   : > { %s1158_s22 = smov %s818_s23  ;;  %s1159_s23 = smov %s900_s28 }
 0x2ab   : > { %s1160_s24 = smov %s889_s25  ;;  %22 = sbr.rel (!%p20_p1) target bundleno = 9 (0x9), region = 104 }
 0x2b2   :  { %466 = vsyncpa [#allocation3], 1 }
 0x2b3   :  { %468 = vsyncpa [#allocation3 + $0x1], 1 }
 0x2b4   :  { %469 = vsyncpa [#allocation6], 1 }
 0x2b5   :  { %470 = vsyncpa [#allocation4], 1 }
 0x2b6   :  { %472 = vsyncpa [#allocation4 + $0x1], 1 }

</bundles_post_ra>
